<compile_context>
chip_gen: v7x
topology: tpu7x:2x2x1
jax: 0.10.0
libtpu: 0.0.40
codegen_flags: <defaults>
</compile_context>

<pallas_src>
import functools

import jax
import jax.numpy as jnp
from jax.experimental import pallas as pl
from jax.experimental.pallas import tpu as pltpu

LANE = 128          # pad logits dim to 128 lanes -> unmasked, lane-dense output stores
MAX_TILE_B = 2048   # largest batch tile; keeps per-tile VMEM well under all chips' limits


def _round_up(x, m):
    return ((x + m - 1) // m) * m


def policy_mlp_kernel(x_ref, w1_ref, b1_ref, w2_ref, b2_ref, w3_ref, b3_ref, o_ref):
    """One batch tile of Linear->ReLU->Linear->ReLU->Linear."""
    # Layer 1: bf16 MXU matmul, f32 accumulate; bias + ReLU in f32 on the VPU.
    h1 = jnp.dot(x_ref[...], w1_ref[...], preferred_element_type=jnp.float32)
    h1 = jnp.maximum(h1 + b1_ref[...], 0.0)
    # Layer 2: 256 -> 128 (bulk of the FLOPs, MXU-friendly K/N).
    h2 = jnp.dot(h1.astype(jnp.bfloat16), w2_ref[...],
                 preferred_element_type=jnp.float32)
    h2 = jnp.maximum(h2 + b2_ref[...], 0.0)
    # Layer 3: logits into the 128-lane padded output.
    out = jnp.dot(h2.astype(jnp.bfloat16), w3_ref[...],
                  preferred_element_type=jnp.float32)
    o_ref[...] = (out + b3_ref[...]).astype(o_ref.dtype)


def prepare_params(params):
    """One-time weight prep (hoisted out of the per-call forward path):
    bf16 weight casts for the MXU, f32 biases, and zero-padding of the
    layer-3 weights/bias out to 128 output lanes.  Returns (prepared, action_dim)."""
    action_dim = params["w3"].shape[1]
    n_out = _round_up(action_dim, LANE)
    w3p = jnp.zeros((params["w3"].shape[0], n_out), jnp.bfloat16)
    w3p = w3p.at[:, :action_dim].set(params["w3"].astype(jnp.bfloat16))
    b3p = jnp.zeros((1, n_out), jnp.float32)
    b3p = b3p.at[:, :action_dim].set(params["b3"].astype(jnp.float32))
    prep = {
        "w1": params["w1"].astype(jnp.bfloat16),
        "b1": params["b1"].astype(jnp.float32),
        "w2": params["w2"].astype(jnp.bfloat16),
        "b2": params["b2"].astype(jnp.float32),
        "w3": w3p,
        "b3": b3p,
    }
    return jax.tree_util.tree_map(jnp.asarray, prep), action_dim


def _choose_batch_tiling(B):
    """Pick (grid_b, tile_b, B_pad): big tiles to amortize per-step overhead and push
    the output DMA toward the HBM roofline, but >= 2 grid steps for larger batches so
    the 'parallel' batch axis actually splits across both v7x TensorCores."""
    B8 = _round_up(B, 8)                      # sublane-aligned batch
    grid_b = pl.cdiv(B8, MAX_TILE_B)
    if B8 >= 512:                             # only split when each half-tile is still large
        grid_b = max(grid_b, 2)
    tile_b = _round_up(pl.cdiv(B8, grid_b), 8)
    return grid_b, tile_b, grid_b * tile_b


@functools.partial(jax.jit, static_argnames=("action_dim",))
def policy_network_forward(x, prep, action_dim):
    """x: (B, state_dim) float32; prep from prepare_params. Returns (B, action_dim) f32."""
    B, state_dim = x.shape
    n_out = prep["w3"].shape[1]
    grid_b, tile_b, B_pad = _choose_batch_tiling(B)

    x_bf = x.astype(jnp.bfloat16)
    if B_pad != B:
        x_bf = jnp.pad(x_bf, ((0, B_pad - B), (0, 0)))

    # Weights / biases use a constant index_map -> DMA'd once, resident in VMEM
    # across all grid steps.  Activations / output are tiled over the batch.
    resident = lambda a: pl.BlockSpec(a.shape, lambda i: tuple(0 for _ in a.shape))

    flops = 2 * B_pad * (state_dim * 256 + 256 * 128 + 128 * n_out)
    bytes_accessed = (
        B_pad * state_dim * 2 + B_pad * n_out * 4              # x in (bf16), logits out (f32)
        + (state_dim * 256 + 256 * 128 + 128 * n_out) * 2      # bf16 weights
        + (256 + 128 + n_out) * 4                              # f32 biases
    )

    out_padded = pl.pallas_call(
        policy_mlp_kernel,
        out_shape=jax.ShapeDtypeStruct((B_pad, n_out), jnp.float32),
        grid=(grid_b,),
        in_specs=[
            pl.BlockSpec((tile_b, state_dim), lambda i: (i, 0)),   # batch-tiled input
            resident(prep["w1"]), resident(prep["b1"]),
            resident(prep["w2"]), resident(prep["b2"]),
            resident(prep["w3"]), resident(prep["b3"]),
        ],
        out_specs=pl.BlockSpec((tile_b, n_out), lambda i: (i, 0)),
        compiler_params=pltpu.CompilerParams(
            dimension_semantics=("parallel",),        # batch tiles shard across v7x's 2 TCs
            vmem_limit_bytes=32 * 1024 * 1024,        # explicit headroom (v5e default 16 MiB)
        ),
        cost_estimate=pl.CostEstimate(
            flops=flops, transcendentals=0, bytes_accessed=bytes_accessed),
    )(x_bf, prep["w1"], prep["b1"], prep["w2"], prep["b2"], prep["w3"], prep["b3"])

    return out_padded[:B, :action_dim]


def init_params(key, state_dim, action_dim):
    """Deterministic PyTorch-style init: U(-1/sqrt(fan_in), 1/sqrt(fan_in))."""
    dims = [(state_dim, 256), (256, 128), (128, action_dim)]
    params = {}
    for i, (fan_in, fan_out) in enumerate(dims, start=1):
        key, kw, kb = jax.random.split(key, 3)
        bound = 1.0 / jnp.sqrt(jnp.float32(fan_in))
        params[f"w{i}"] = jax.random.uniform(
            kw, (fan_in, fan_out), jnp.float32, -bound, bound)
        # bias kept 2D (1, fan_out) for clean broadcast inside the kernel
        params[f"b{i}"] = jax.random.uniform(
            kb, (1, fan_out), jnp.float32, -bound, bound)
    return params


def reference_forward(x, params):
    """JAX reference mirroring the kernel's bf16-matmul / f32-accumulate math."""
    w1 = params["w1"].astype(jnp.bfloat16)
    w2 = params["w2"].astype(jnp.bfloat16)
    w3 = params["w3"].astype(jnp.bfloat16)
    h1 = jnp.dot(x.astype(jnp.bfloat16), w1,
                 preferred_element_type=jnp.float32) + params["b1"]
    h1 = jnp.maximum(h1, 0.0)
    h2 = jnp.dot(h1.astype(jnp.bfloat16), w2,
                 preferred_element_type=jnp.float32) + params["b2"]
    h2 = jnp.maximum(h2, 0.0)
    return jnp.dot(h2.astype(jnp.bfloat16), w3,
                   preferred_element_type=jnp.float32) + params["b3"]


if __name__ == "__main__":
    key = jax.random.PRNGKey(0)
    # Small-but-real shapes: batch amortizes launch overhead and exercises grid=2.
    B, state_dim, action_dim = 512, 32, 8

    key, kx = jax.random.split(key)
    x = jax.random.normal(kx, (B, state_dim), jnp.float32)
    params = init_params(key, state_dim, action_dim)

    prep, adim = prepare_params(params)              # one-time weight prep (hoisted)
    out = jax.block_until_ready(policy_network_forward(x, prep, adim))
    ref = reference_forward(x, params)

    assert out.shape == (B, action_dim), out.shape
    assert jnp.allclose(out, ref, atol=1e-2, rtol=1e-2), "mismatch vs JAX reference"
    print("KERNEL_OK")
</pallas_src>

<mosaic_0001>
module attributes {stable_mosaic.version = 11 : i64} {
  func.func @policy_mlp_kernel(%arg0: i32, %arg1: memref<256x32xbf16, #tpu.memory_space<vmem>>, %arg2: memref<32x256xbf16, #tpu.memory_space<vmem>>, %arg3: memref<1x256xf32, #tpu.memory_space<vmem>>, %arg4: memref<256x128xbf16, #tpu.memory_space<vmem>>, %arg5: memref<1x128xf32, #tpu.memory_space<vmem>>, %arg6: memref<128x128xbf16, #tpu.memory_space<vmem>>, %arg7: memref<1x128xf32, #tpu.memory_space<vmem>>, %arg8: memref<256x128xf32, #tpu.memory_space<vmem>>) attributes {dimension_semantics = [#tpu.dimension_semantics<parallel>], iteration_bounds = array<i64: 2>, scalar_prefetch = 0 : i64, scratch_operands = 0 : i64, tpu.core_type = #tpu.core_type<tc>, window_params = [{transform_indices = @transform_0, window_bounds = array<i64: 256, 32>}, {pipeline_mode = #tpu.pipeline_mode<synchronous>, transform_indices = @transform_1, window_bounds = array<i64: 32, 256>}, {pipeline_mode = #tpu.pipeline_mode<synchronous>, transform_indices = @transform_2, window_bounds = array<i64: 1, 256>}, {pipeline_mode = #tpu.pipeline_mode<synchronous>, transform_indices = @transform_3, window_bounds = array<i64: 256, 128>}, {pipeline_mode = #tpu.pipeline_mode<synchronous>, transform_indices = @transform_4, window_bounds = array<i64: 1, 128>}, {pipeline_mode = #tpu.pipeline_mode<synchronous>, transform_indices = @transform_5, window_bounds = array<i64: 128, 128>}, {pipeline_mode = #tpu.pipeline_mode<synchronous>, transform_indices = @transform_6, window_bounds = array<i64: 1, 128>}, {transform_indices = @transform_7, window_bounds = array<i64: 256, 128>}]} {
    %c0 = arith.constant 0 : index
    %c0_0 = arith.constant 0 : index
    %0 = vector.load %arg1[%c0, %c0_0] : memref<256x32xbf16, #tpu.memory_space<vmem>>, vector<256x32xbf16>
    %c0_1 = arith.constant 0 : index
    %c0_2 = arith.constant 0 : index
    %1 = vector.load %arg2[%c0_1, %c0_2] : memref<32x256xbf16, #tpu.memory_space<vmem>>, vector<32x256xbf16>
    %cst = arith.constant dense<0.000000e+00> : vector<256x256xf32>
    %2 = tpu.matmul %0, %1, %cst {dimension_numbers = #tpu.dot_dimension_numbers<[1], [0], [0], [1], [0, 0, 1, 1], [], []>} : vector<256x32xbf16>, vector<32x256xbf16>, vector<256x256xf32> -> vector<256x256xf32>
    %c0_3 = arith.constant 0 : index
    %c0_4 = arith.constant 0 : index
    %3 = vector.load %arg3[%c0_3, %c0_4] : memref<1x256xf32, #tpu.memory_space<vmem>>, vector<1x256xf32>
    %4 = vector.broadcast %3 : vector<1x256xf32> to vector<256x256xf32>
    %5 = arith.addf %2, %4 : vector<256x256xf32>
    %cst_5 = arith.constant 0.000000e+00 : f32
    %6 = vector.broadcast %cst_5 : f32 to vector<256x256xf32>
    %7 = arith.maximumf %5, %6 : vector<256x256xf32>
    %8 = arith.truncf %7 : vector<256x256xf32> to vector<256x256xbf16>
    %c0_6 = arith.constant 0 : index
    %c0_7 = arith.constant 0 : index
    %9 = vector.load %arg4[%c0_6, %c0_7] : memref<256x128xbf16, #tpu.memory_space<vmem>>, vector<256x128xbf16>
    %cst_8 = arith.constant dense<0.000000e+00> : vector<256x128xf32>
    %10 = tpu.matmul %8, %9, %cst_8 {dimension_numbers = #tpu.dot_dimension_numbers<[1], [0], [0], [1], [0, 0, 1, 1], [], []>} : vector<256x256xbf16>, vector<256x128xbf16>, vector<256x128xf32> -> vector<256x128xf32>
    %c0_9 = arith.constant 0 : index
    %c0_10 = arith.constant 0 : index
    %11 = vector.load %arg5[%c0_9, %c0_10] : memref<1x128xf32, #tpu.memory_space<vmem>>, vector<1x128xf32>
    %12 = vector.broadcast %11 : vector<1x128xf32> to vector<256x128xf32>
    %13 = arith.addf %10, %12 : vector<256x128xf32>
    %cst_11 = arith.constant 0.000000e+00 : f32
    %14 = vector.broadcast %cst_11 : f32 to vector<256x128xf32>
    %15 = arith.maximumf %13, %14 : vector<256x128xf32>
    %16 = arith.truncf %15 : vector<256x128xf32> to vector<256x128xbf16>
    %c0_12 = arith.constant 0 : index
    %c0_13 = arith.constant 0 : index
    %17 = vector.load %arg6[%c0_12, %c0_13] : memref<128x128xbf16, #tpu.memory_space<vmem>>, vector<128x128xbf16>
    %cst_14 = arith.constant dense<0.000000e+00> : vector<256x128xf32>
    %18 = tpu.matmul %16, %17, %cst_14 {dimension_numbers = #tpu.dot_dimension_numbers<[1], [0], [0], [1], [0, 0, 1, 1], [], []>} : vector<256x128xbf16>, vector<128x128xbf16>, vector<256x128xf32> -> vector<256x128xf32>
    %c0_15 = arith.constant 0 : index
    %c0_16 = arith.constant 0 : index
    %19 = vector.load %arg7[%c0_15, %c0_16] : memref<1x128xf32, #tpu.memory_space<vmem>>, vector<1x128xf32>
    %20 = vector.broadcast %19 : vector<1x128xf32> to vector<256x128xf32>
    %21 = arith.addf %18, %20 : vector<256x128xf32>
    %c0_17 = arith.constant 0 : index
    %c0_18 = arith.constant 0 : index
    %22 = vector.load %arg8[%c0_17, %c0_18] : memref<256x128xf32, #tpu.memory_space<vmem>>, vector<256x128xf32>
    tpu.vector_store %arg8[%c0_17, %c0_18], %21 {strides = array<i32>} : memref<256x128xf32, #tpu.memory_space<vmem>>, vector<256x128xf32>,
    return
  }
  func.func @transform_0(%arg0: i32) -> (i32, i32) {
    %c0_i32 = arith.constant 0 : i32
    %c0_i32_0 = arith.constant 0 : i32
    return %arg0, %c0_i32 : i32, i32
  }
  func.func @transform_1(%arg0: i32) -> (i32, i32) {
    %c0_i32 = arith.constant 0 : i32
    %c0_i32_0 = arith.constant 0 : i32
    %c0_i32_1 = arith.constant 0 : i32
    return %c0_i32, %c0_i32_0 : i32, i32
  }
  func.func @transform_2(%arg0: i32) -> (i32, i32) {
    %c0_i32 = arith.constant 0 : i32
    %c0_i32_0 = arith.constant 0 : i32
    %c0_i32_1 = arith.constant 0 : i32
    return %c0_i32, %c0_i32_0 : i32, i32
  }
  func.func @transform_3(%arg0: i32) -> (i32, i32) {
    %c0_i32 = arith.constant 0 : i32
    %c0_i32_0 = arith.constant 0 : i32
    %c0_i32_1 = arith.constant 0 : i32
    return %c0_i32, %c0_i32_0 : i32, i32
  }
  func.func @transform_4(%arg0: i32) -> (i32, i32) {
    %c0_i32 = arith.constant 0 : i32
    %c0_i32_0 = arith.constant 0 : i32
    %c0_i32_1 = arith.constant 0 : i32
    return %c0_i32, %c0_i32_0 : i32, i32
  }
  func.func @transform_5(%arg0: i32) -> (i32, i32) {
    %c0_i32 = arith.constant 0 : i32
    %c0_i32_0 = arith.constant 0 : i32
    %c0_i32_1 = arith.constant 0 : i32
    return %c0_i32, %c0_i32_0 : i32, i32
  }
  func.func @transform_6(%arg0: i32) -> (i32, i32) {
    %c0_i32 = arith.constant 0 : i32
    %c0_i32_0 = arith.constant 0 : i32
    %c0_i32_1 = arith.constant 0 : i32
    return %c0_i32, %c0_i32_0 : i32, i32
  }
  func.func @transform_7(%arg0: i32) -> (i32, i32) {
    %c0_i32 = arith.constant 0 : i32
    %c0_i32_0 = arith.constant 0 : i32
    return %arg0, %c0_i32 : i32, i32
  }
}

</mosaic_0001>

<bundles_post_ra>
// kernel: policy_network_forward.1
= control target key start
LH: loop header
LB: loop body
LE: loop exit
PB: predicated region body
PF: predicated region fallthrough
CT: control target
= control target key end

     0   :  { %s1798_s24 = smov 0   ;;  %s2156_s0 = inlined_call_operand.vmem [shape: bf16[512,32], index: 0, kind: input, shape index: {}]   ;;  %s2157_s1 = inlined_call_operand.vmem [shape: bf16[32,256], index: 1, kind: input, shape index: {}]   ;;  %s2158_s2 = inlined_call_operand.vmem [shape: f32[1,256], index: 2, kind: input, shape index: {}]   ;;  %s2159_s3 = inlined_call_operand.vmem [shape: bf16[256,128], index: 3, kind: input, shape index: {}]   ;;  %s2160_s4 = inlined_call_operand.vmem [shape: f32[1,128], index: 4, kind: input, shape index: {}]   ;;  %s2161_s5 = inlined_call_operand.vmem [shape: bf16[128,128], index: 5, kind: input, shape index: {}]   ;;  %s2162_s6 = inlined_call_operand.vmem [shape: f32[1,128], index: 6, kind: input, shape index: {}]   ;;  %s2163_s7 = inlined_call_operand.vmem [shape: f32[512,128], index: 7, kind: output, shape index: {}]  }
   0x1 LB: > { %s1433_s25 = sadd.s32 4294967295, %s1755_s24   ;;  %p1437_p0 = scmp.ge.s32.totalorder %s1755_s24, 1  ;;  %s1755_s24 = sphi %s1798_s24, %s17_s24  }
   0x2   : > { %p238_p1 = scmp.lt.s32.totalorder %s1755_s24, 3 }
   0x4   : > { %p239_p2 = pnand %p1437_p0, %p238_p1 }
   0x5   : > { %v1703_v0 = vld [vmem:[%s2157_s1 + $0x4] ss:$8 sps:$4 sm:$0xff] (!%p239_p2)   ;;  %s1438_s28 = sshll.u32 (!%p239_p2), %s1433_s25, 5  ;;  %v1705_v1 = vld [vmem:[%s2157_s1] ss:$8 sps:$4 sm:$0xff] (!%p239_p2)   ;;  %v1757_v2 = vmov (!%p239_p2), 0   ;;  %v321_v37 = vlaneseq (!%p239_p2) }
   0x6   : > { %242 = sbr.rel (%p239_p2) target bundleno = 800 (0x320), region = 48  ;;  %512 = vmatprep.mubr.bf16.mxu0 (!%p239_p2), %v1757_v2  ;;  %p271_p3 = scmp.lt.s32.totalorder (!%p239_p2), %s1438_s28, 63  ;;  %632 = vmatprep.mubr.bf16.mxu1 (!%p239_p2), %v1757_v2  ;;  %v1706_v3 = vld [vmem:[%s2157_s1 + $0x14] ss:$8 sps:$4 sm:$0xff] (!%p239_p2)   ;;  %v1708_v4 = vld [vmem:[%s2157_s1 + $0x10] ss:$8 sps:$4 sm:$0xff] (!%p239_p2)  }
   0x7   : > { %480 = vmatprep.subr.bf16.mxu0 (!%p239_p2), %v1703_v0  ;;  %1690 = vmatprep.subr.bf16.mxu1 (!%p239_p2), %v1703_v0  ;;  %v1725_v5 = vld [vmem:[%s2159_s3 + $0x40] sm:$0xff] (!%p239_p2)   ;;  %vm431_vm0 = vcmask (!%p239_p2), 261120   ;;  %v1727_v9 = vld [vmem:[%s2159_s3 + $0x48] sm:$0xff] (!%p239_p2)   ;;  %v1729_v13 = vld [vmem:[%s2159_s3 + $0x50] sm:$0xff] (!%p239_p2)   ;;  %v322_v38 = vshrl.u32 (!%p239_p2), %v321_v37, 7 }
   0x8   : > { %481 = vmatpush1.bf16.msra.mxu0 (!%p239_p2), %v1705_v1  ;;  %1692 = vmatpush1.bf16.msra.mxu1 (!%p239_p2), %v1705_v1  ;;  %v1726_v8 = vld [vmem:[%s2159_s3] sm:$0xff] (!%p239_p2)   ;;  %v1728_v11 = vld [vmem:[%s2159_s3 + $0x8] sm:$0xff] (!%p239_p2)   ;;  %v1730_v15 = vld [vmem:[%s2159_s3 + $0x10] sm:$0xff] (!%p239_p2)  }
   0x9   : > { %482 = vmatprep.subr.bf16.mxu0 (!%p239_p2), %v1706_v3  ;;  %1691 = vmatprep.subr.bf16.mxu1 (!%p239_p2), %v1706_v3  ;;  %v1731_v16 = vld [vmem:[%s2159_s3 + $0x58] sm:$0xff] (!%p239_p2)   ;;  %v1733_v19 = vld [vmem:[%s2159_s3 + $0x60] sm:$0xff] (!%p239_p2)   ;;  %v1735_v22 = vld [vmem:[%s2159_s3 + $0x68] sm:$0xff] (!%p239_p2)   ;;  %v323_v39 = vsub.s32 (!%p239_p2), 0, %v322_v38  ;;  %v327_v41 = vsub.s32 (!%p239_p2), 1, %v322_v38 }
   0xa   : > { %v1732_v18 = vld [vmem:[%s2159_s3 + $0x18] sm:$0xff] (!%p239_p2)   ;;  %v1734_v21 = vld [vmem:[%s2159_s3 + $0x20] sm:$0xff] (!%p239_p2)   ;;  %v1736_v24 = vld [vmem:[%s2159_s3 + $0x28] sm:$0xff] (!%p239_p2)  }
   0xb   : > { %v1737_v33 = vld [vmem:[%s2159_s3 + $0x70] sm:$0xff] (!%p239_p2)   ;;  %v1739_v35 = vld [vmem:[%s2159_s3 + $0x78] sm:$0xff] (!%p239_p2)   ;;  %v319_v40 = vld [vmem:[%s2158_s2] sm:$0x3] (!%p239_p2) }
   0xc   : > { %483 = vmatpush1.bf16.msra.mxu0 (!%p239_p2), %v1708_v4  ;;  %1693 = vmatpush1.bf16.msra.mxu1 (!%p239_p2), %v1708_v4  ;;  %v1738_v34 = vld [vmem:[%s2159_s3 + $0x30] sm:$0xff] (!%p239_p2)   ;;  %v1740_v36 = vld [vmem:[%s2159_s3 + $0x38] sm:$0xff] (!%p239_p2)   ;;  %v1925_v42 = vrot.slane (!%p239_p2), %v319_v40, %v323_v39  ;;  %v1927_v43 = vrot.slane (!%p239_p2), %v319_v40, %v327_v41  ;;  %v1741_v51 = vld [vmem:[%s2161_s5] sm:$0xff] (!%p239_p2)  }
   0xd   : > { %s2165_s28 = smov (!%p271_p3, %s1438_s28), 63  ;;  %1506 = vmatprep.subr.bf16.mxu1 %v1725_v5  ;;  %v1742_v52 = vld [vmem:[%s2161_s5 + $0x8] sm:$0xff]   ;;  %1642 = vmatprep.subr.bf16.mxu0 %v1741_v51  ;;  %v1743_v59 = vld [vmem:[%s2161_s5 + $0x10] sm:$0xff]  }
   0xe   : > { %s1439_s14 = sshll.u32 %s2165_s28, 2  ;;  %s1441_s29 = sshll.u32 %s2165_s28, 3 }
   0xf   : > { %s1829_s17 = scalar_lea.vmem %s2156_s0, %s1439_s14  ;;  %s2087_s10 = scalar_lea.vmem %s2163_s7, %s1441_s29 }
  0x10   : > { %v1709_v6 = vld [vmem:[%s1829_s17] sm:$0xff]   ;;  %v1710_v7 = vld [vmem:[%s1829_s17 + $0x8] sm:$0xff]   ;;  %v1711_v12 = vld [vmem:[%s1829_s17 + $0x10] sm:$0xff]  }
  0x11   : > { %1462 = vmatmul.mubr.msk.bf16.vlgmr.msra.gmra.mrb[0].mxu0 %vm431_vm0, %v1709_v6  ;;  %v1721_v10 = vld [vmem:[%s1829_s17 + $0x60] sm:$0xff]   ;;  %v1722_v14 = vld [vmem:[%s1829_s17 + $0x68] sm:$0xff]   ;;  %v1712_v17 = vld [vmem:[%s1829_s17 + $0x18] sm:$0xff]  }
  0x12   : > { %522 = vmatprep.mubr.bf16.mxu0 %v1757_v2  ;;  %1474 = vmatmul.mubr.msk.bf16.vlgmr.msra.gmra.mrb[0].mxu1 %vm431_vm0, %v1721_v10  ;;  %v1723_v20 = vld [vmem:[%s1829_s17 + $0x70] sm:$0xff]   ;;  %v1713_v23 = vld [vmem:[%s1829_s17 + $0x20] sm:$0xff]   ;;  %v1724_v25 = vld [vmem:[%s1829_s17 + $0x78] sm:$0xff]  }
  0x13   : > { %642 = vmatprep.mubr.bf16.mxu1 %v1757_v2  ;;  %1507 = vmatpush3.bf16.msra.mxu1 %v1726_v8  ;;  %v1714_v26 = vld [vmem:[%s1829_s17 + $0x28] sm:$0xff]   ;;  %v1715_v27 = vld [vmem:[%s1829_s17 + $0x30] sm:$0xff]   ;;  %v1716_v28 = vld [vmem:[%s1829_s17 + $0x38] sm:$0xff]  }
  0x14   : > { %1508 = vmatprep.subr.bf16.mxu1 %v1727_v9  ;;  %v1717_v29 = vld [vmem:[%s1829_s17 + $0x40] sm:$0xff]   ;;  %v1718_v30 = vld [vmem:[%s1829_s17 + $0x48] sm:$0xff]   ;;  %v1719_v31 = vld [vmem:[%s1829_s17 + $0x50] sm:$0xff]   ;;  %1643 = vmatpush3.bf16.msra.mxu0 %v1741_v51 }
  0x15   : > { %v1720_v32 = vld [vmem:[%s1829_s17 + $0x58] sm:$0xff]   ;;  %1644 = vmatprep.subr.bf16.mxu0 %v1742_v52 }
  0x17   : > { %1509 = vmatpush3.bf16.msra.mxu1 %v1728_v11 }
  0x18   : > { %1510 = vmatprep.subr.bf16.mxu1 %v1729_v13  ;;  %1645 = vmatpush3.bf16.msra.mxu0 %v1742_v52 }
  0x19   : > { %1463 = vmatmul.mubr.msk.bf16.gmra.mrb[4].mxu0 %vm431_vm0, %v1710_v7  ;;  %1646 = vmatprep.subr.bf16.mxu0 %v1743_v59 }
  0x1a   : > { %532 = vmatprep.mubr.bf16.mxu0 %v1757_v2  ;;  %1475 = vmatmul.mubr.msk.bf16.gmra.mrb[4].mxu1 %vm431_vm0, %v1722_v14 }
  0x1b   : > { %652 = vmatprep.mubr.bf16.mxu1 %v1757_v2  ;;  %1511 = vmatpush3.bf16.msra.mxu1 %v1730_v15 }
  0x1c   : > { %1512 = vmatprep.subr.bf16.mxu1 %v1731_v16  ;;  %1647 = vmatpush3.bf16.msra.mxu0 %v1743_v59 }
  0x1f   : > { %1513 = vmatpush3.bf16.msra.mxu1 %v1732_v18 }
  0x20   : > { %1514 = vmatprep.subr.bf16.mxu1 %v1733_v19 }
  0x21   : > { %1464 = vmatmul.mubr.msk.bf16.gmra.mrb[8].mxu0 %vm431_vm0, %v1711_v12 }
  0x22   : > { %542 = vmatprep.mubr.bf16.mxu0 %v1757_v2  ;;  %1476 = vmatmul.mubr.msk.bf16.gmra.mrb[8].mxu1 %vm431_vm0, %v1723_v20 }
  0x23   : > { %662 = vmatprep.mubr.bf16.mxu1 %v1757_v2  ;;  %1515 = vmatpush3.bf16.msra.mxu1 %v1734_v21 }
  0x24   : > { %1516 = vmatprep.subr.bf16.mxu1 %v1735_v22 }
  0x27   : > { %1517 = vmatpush3.bf16.msra.mxu1 %v1736_v24 }
  0x28   : > { %1518 = vmatprep.subr.bf16.mxu1 %v1737_v33 }
  0x29   : > { %1465 = vmatmul.mubr.msk.bf16.gmra.mrb[12].mxu0 %vm431_vm0, %v1712_v17 }
  0x2a   : > { %552 = vmatprep.mubr.bf16.mxu0 %v1757_v2  ;;  %1477 = vmatmul.mubr.msk.bf16.gmra.mrb[12].mxu1 %vm431_vm0, %v1724_v25 }
  0x2b   : > { %1519 = vmatpush3.bf16.msra.mxu1 %v1738_v34 }
  0x2c   : > { %1520 = vmatprep.subr.bf16.mxu1 %v1739_v35 }
  0x2f   : > { %1521 = vmatpush3.bf16.msra.mxu1 %v1740_v36 }
  0x31   : > { %1466 = vmatmul.mubr.msk.bf16.gmra.mrb[16].mxu0 %vm431_vm0, %v1713_v23 }
  0x32   : > { %562 = vmatprep.mubr.bf16.mxu0 %v1757_v2 }
  0x39   : > { %1467 = vmatmul.mubr.msk.bf16.gmra.mrb[20].mxu0 %vm431_vm0, %v1714_v26 }
  0x3a   : > { %572 = vmatprep.mubr.bf16.mxu0 %v1757_v2 }
  0x41   : > { %1468 = vmatmul.mubr.msk.bf16.gmra.mrb[24].mxu0 %vm431_vm0, %v1715_v27 }
  0x42   : > { %582 = vmatprep.mubr.bf16.mxu0 %v1757_v2 }
  0x49   : > { %1469 = vmatmul.mubr.msk.bf16.gmra.mrb[28].mxu0 %vm431_vm0, %v1716_v28 }
  0x4a   : > { %592 = vmatprep.mubr.bf16.mxu0 %v1757_v2 }
  0x51   : > { %1470 = vmatmul.mubr.msk.bf16.gmra.mrb[32].mxu0 %vm431_vm0, %v1717_v29 }
  0x52   : > { %602 = vmatprep.mubr.bf16.mxu0 %v1757_v2 }
  0x59   : > { %1471 = vmatmul.mubr.msk.bf16.gmra.mrb[36].mxu0 %vm431_vm0, %v1718_v30 }
  0x5a   : > { %612 = vmatprep.mubr.bf16.mxu0 %v1757_v2 }
  0x61   : > { %1472 = vmatmul.mubr.msk.bf16.gmra.mrb[40].mxu0 %vm431_vm0, %v1719_v31 }
  0x62   : > { %622 = vmatprep.mubr.bf16.mxu0 %v1757_v2 }
  0x69   : > { %1473 = vmatmul.mubr.msk.bf16.gmra.mrb[44].mxu0 %vm431_vm0, %v1720_v32 }
  0xe4   : > { %v514_v44 = vpop.f32.mrb[0].mxu0 }
  0xe5   : > { %v515_v45 = vadd.f32 %v514_v44, %v1925_v42  ;;  %v516_v46 = vpop.f32.mrb[1].mxu0  ;;  %v634_v4 = vpop.f32.mrb[0].mxu1 }
  0xe6   : > { %v517_v47 = vadd.f32 %v516_v46, %v1927_v43  ;;  %v518_v48 = vpop.f32.mrb[2].mxu0  ;;  %v635_v6 = vadd.f32 %v634_v4, %v1925_v42  ;;  %v636_v7 = vpop.f32.mrb[1].mxu1 }
  0xe7   : > { %v519_v49 = vadd.f32 %v518_v48, %v1925_v42  ;;  %v520_v50 = vpop.f32.mrb[3].mxu0  ;;  %v673_v54 = vmax.f32 %v515_v45, 0.0  ;;  %v637_v10 = vadd.f32 %v636_v7, %v1927_v43  ;;  %v638_v11 = vpop.f32.mrb[2].mxu1 }
  0xe8   : > { %v521_v53 = vadd.f32 %v520_v50, %v1927_v43  ;;  %v674_v56 = vmax.f32 %v517_v47, 0.0  ;;  %v721_v14 = vmax.f32 %v635_v6, 0.0  ;;  %v639_v15 = vadd.f32 %v638_v11, %v1925_v42  ;;  %v640_v16 = vpop.f32.mrb[3].mxu1 }
  0xe9   : > { %v675_v55 = vmax.f32 %v519_v49, 0.0  ;;  %v722_v18 = vmax.f32 %v637_v10, 0.0  ;;  %v641_v19 = vadd.f32 %v640_v16, %v1927_v43 }
  0xea   : > { %v676_v57 = vmax.f32 %v521_v53, 0.0  ;;  %v723_v22 = vmax.f32 %v639_v15, 0.0 }
  0xeb   : > { %v737_v58 = vpack.c.bf16 %v675_v55, %v673_v54  ;;  %v724_v25 = vmax.f32 %v641_v19, 0.0 }
  0xec   : > { %v738_v60 = vpack.c.bf16 %v676_v57, %v674_v56  ;;  %v524_v61 = vpop.f32.mrb[4].mxu0  ;;  %v1952_v28 = vpack.c.bf16 %v723_v22, %v721_v14 }
  0xed   : > { %v525_v62 = vadd.f32 %v524_v61, %v1925_v42  ;;  %v526_v63 = vpop.f32.mrb[5].mxu0  ;;  %v1955_v31 = vpack.c.bf16 %v724_v25, %v722_v18  ;;  %v644_v32 = vpop.f32.mrb[4].mxu1 }
  0xee   : > { %v527_v0 = vadd.f32 %v526_v63, %v1927_v43  ;;  %v528_v1 = vpop.f32.mrb[6].mxu0  ;;  %936 = vmatprep.mubr.bf16.mxu1 %v738_v60  ;;  %v645_v34 = vadd.f32 %v644_v32, %v1925_v42  ;;  %v646_v35 = vpop.f32.mrb[5].mxu1 }
  0xef   : > { %v529_v2 = vadd.f32 %v528_v1, %v1925_v42  ;;  %v530_v3 = vpop.f32.mrb[7].mxu0  ;;  %937 = vmatmul.mubr.bf16.vlgmr.msra.gmra.mrb[16].mxu1 %v737_v58  ;;  %v677_v8 = vmax.f32 %v525_v62, 0.0  ;;  %v647_v38 = vadd.f32 %v646_v35, %v1927_v43  ;;  %v648_v39 = vpop.f32.mrb[6].mxu1 }
  0xf0   : > { %v531_v5 = vadd.f32 %v530_v3, %v1927_v43  ;;  %v678_v12 = vmax.f32 %v527_v0, 0.0  ;;  %v725_v44 = vmax.f32 %v645_v34, 0.0  ;;  %v649_v45 = vadd.f32 %v648_v39, %v1925_v42  ;;  %v650_v46 = vpop.f32.mrb[7].mxu1 }
  0xf1   : > { %v679_v9 = vmax.f32 %v529_v2, 0.0  ;;  %v726_v48 = vmax.f32 %v647_v38, 0.0  ;;  %v651_v49 = vadd.f32 %v650_v46, %v1927_v43 }
  0xf2   : > { %v680_v13 = vmax.f32 %v531_v5, 0.0  ;;  %v727_v52 = vmax.f32 %v649_v45, 0.0 }
  0xf3   : > { %v739_v17 = vpack.c.bf16 %v679_v9, %v677_v8  ;;  %v728_v55 = vmax.f32 %v651_v49, 0.0 }
  0xf4   : > { %v740_v20 = vpack.c.bf16 %v680_v13, %v678_v12  ;;  %v534_v21 = vpop.f32.mrb[8].mxu0  ;;  %v1964_v58 = vpack.c.bf16 %v727_v52, %v725_v44 }
  0xf5   : > { %v535_v23 = vadd.f32 %v534_v21, %v1925_v42  ;;  %v536_v24 = vpop.f32.mrb[9].mxu0  ;;  %v1967_v61 = vpack.c.bf16 %v728_v55, %v726_v48  ;;  %v654_v62 = vpop.f32.mrb[8].mxu1 }
  0xf6   : > { %v537_v26 = vadd.f32 %v536_v24, %v1927_v43  ;;  %v538_v27 = vpop.f32.mrb[10].mxu0  ;;  %944 = vmatprep.mubr.bf16.mxu1 %v740_v20  ;;  %v655_v0 = vadd.f32 %v654_v62, %v1925_v42  ;;  %v656_v1 = vpop.f32.mrb[9].mxu1 }
  0xf7   : > { %v539_v29 = vadd.f32 %v538_v27, %v1925_v42  ;;  %v540_v30 = vpop.f32.mrb[11].mxu0  ;;  %945 = vmatmul.mubr.bf16.gmra.mrb[20].mxu1 %v739_v17  ;;  %v681_v36 = vmax.f32 %v535_v23, 0.0  ;;  %v657_v4 = vadd.f32 %v656_v1, %v1927_v43  ;;  %v658_v5 = vpop.f32.mrb[10].mxu1 }
  0xf8   : > { %v541_v33 = vadd.f32 %v540_v30, %v1927_v43  ;;  %v682_v40 = vmax.f32 %v537_v26, 0.0  ;;  %v729_v8 = vmax.f32 %v655_v0, 0.0  ;;  %v659_v9 = vadd.f32 %v658_v5, %v1925_v42  ;;  %v660_v10 = vpop.f32.mrb[11].mxu1 }
  0xf9   : > { %v683_v37 = vmax.f32 %v539_v29, 0.0  ;;  %v730_v12 = vmax.f32 %v657_v4, 0.0  ;;  %v661_v13 = vadd.f32 %v660_v10, %v1927_v43 }
  0xfa   : > { %v684_v41 = vmax.f32 %v541_v33, 0.0  ;;  %v731_v16 = vmax.f32 %v659_v9, 0.0 }
  0xfb   : > { %v741_v47 = vpack.c.bf16 %v683_v37, %v681_v36  ;;  %v732_v19 = vmax.f32 %v661_v13, 0.0 }
  0xfc   : > { %v742_v50 = vpack.c.bf16 %v684_v41, %v682_v40  ;;  %v544_v51 = vpop.f32.mrb[12].mxu0  ;;  %v1976_v22 = vpack.c.bf16 %v731_v16, %v729_v8 }
  0xfd   : > { %v545_v53 = vadd.f32 %v544_v51, %v1925_v42  ;;  %v546_v54 = vpop.f32.mrb[13].mxu0  ;;  %v1979_v25 = vpack.c.bf16 %v732_v19, %v730_v12  ;;  %v664_v26 = vpop.f32.mrb[12].mxu1 }
  0xfe   : > { %v547_v56 = vadd.f32 %v546_v54, %v1927_v43  ;;  %v548_v57 = vpop.f32.mrb[14].mxu0  ;;  %952 = vmatprep.mubr.bf16.mxu1 %v742_v50  ;;  %v665_v29 = vadd.f32 %v664_v26, %v1925_v42  ;;  %v666_v30 = vpop.f32.mrb[13].mxu1 }
  0xff   : > { %v549_v59 = vadd.f32 %v548_v57, %v1925_v42  ;;  %v550_v60 = vpop.f32.mrb[15].mxu0  ;;  %953 = vmatmul.mubr.bf16.gmra.mrb[24].mxu1 %v741_v47  ;;  %v685_v2 = vmax.f32 %v545_v53, 0.0  ;;  %v667_v34 = vadd.f32 %v666_v30, %v1927_v43  ;;  %v668_v35 = vpop.f32.mrb[14].mxu1 }
 0x100   : > { %v551_v63 = vadd.f32 %v550_v60, %v1927_v43  ;;  %v686_v6 = vmax.f32 %v547_v56, 0.0  ;;  %v733_v38 = vmax.f32 %v665_v29, 0.0  ;;  %v669_v39 = vadd.f32 %v668_v35, %v1925_v42  ;;  %v670_v40 = vpop.f32.mrb[15].mxu1 }
 0x101   : > { %v687_v3 = vmax.f32 %v549_v59, 0.0  ;;  %v734_v44 = vmax.f32 %v667_v34, 0.0  ;;  %v671_v45 = vadd.f32 %v670_v40, %v1927_v43 }
 0x102   : > { %v688_v7 = vmax.f32 %v551_v63, 0.0  ;;  %v735_v48 = vmax.f32 %v669_v39, 0.0 }
 0x103   : > { %v743_v11 = vpack.c.bf16 %v687_v3, %v685_v2  ;;  %v736_v51 = vmax.f32 %v671_v45, 0.0 }
 0x104   : > { %v744_v14 = vpack.c.bf16 %v688_v7, %v686_v6  ;;  %v554_v15 = vpop.f32.mrb[16].mxu0  ;;  %v1988_v54 = vpack.c.bf16 %v735_v48, %v733_v38 }
 0x105   : > { %v555_v17 = vadd.f32 %v554_v15, %v1925_v42  ;;  %v556_v18 = vpop.f32.mrb[17].mxu0  ;;  %v1991_v57 = vpack.c.bf16 %v736_v51, %v734_v44 }
 0x106   : > { %v557_v20 = vadd.f32 %v556_v18, %v1927_v43  ;;  %v558_v21 = vpop.f32.mrb[18].mxu0  ;;  %960 = vmatprep.mubr.bf16.mxu1 %v744_v14 }
 0x107   : > { %v559_v23 = vadd.f32 %v558_v21, %v1925_v42  ;;  %v560_v24 = vpop.f32.mrb[19].mxu0  ;;  %961 = vmatmul.mubr.bf16.gmra.mrb[28].mxu1 %v743_v11  ;;  %v689_v32 = vmax.f32 %v555_v17, 0.0 }
 0x108   : > { %v561_v27 = vadd.f32 %v560_v24, %v1927_v43  ;;  %v690_v36 = vmax.f32 %v557_v20, 0.0 }
 0x109   : > { %v691_v33 = vmax.f32 %v559_v23, 0.0 }
 0x10a   : > { %v692_v37 = vmax.f32 %v561_v27, 0.0 }
 0x10b   : > { %v745_v41 = vpack.c.bf16 %v691_v33, %v689_v32 }
 0x10c   : > { %v746_v46 = vpack.c.bf16 %v692_v37, %v690_v36  ;;  %v564_v47 = vpop.f32.mrb[20].mxu0 }
 0x10d   : > { %v565_v49 = vadd.f32 %v564_v47, %v1925_v42  ;;  %v566_v50 = vpop.f32.mrb[21].mxu0 }
 0x10e   : > { %v567_v52 = vadd.f32 %v566_v50, %v1927_v43  ;;  %v568_v53 = vpop.f32.mrb[22].mxu0  ;;  %968 = vmatprep.mubr.bf16.mxu1 %v746_v46 }
 0x10f   : > { %v569_v55 = vadd.f32 %v568_v53, %v1925_v42  ;;  %v570_v56 = vpop.f32.mrb[23].mxu0  ;;  %969 = vmatmul.mubr.bf16.gmra.mrb[32].mxu1 %v745_v41  ;;  %v693_v60 = vmax.f32 %v565_v49, 0.0 }
 0x110   : > { %v571_v59 = vadd.f32 %v570_v56, %v1927_v43  ;;  %v694_v63 = vmax.f32 %v567_v52, 0.0 }
 0x111   : > { %v695_v62 = vmax.f32 %v569_v55, 0.0 }
 0x112   : > { %v696_v0 = vmax.f32 %v571_v59, 0.0 }
 0x113   : > { %v747_v1 = vpack.c.bf16 %v695_v62, %v693_v60 }
 0x114   : > { %v748_v2 = vpack.c.bf16 %v696_v0, %v694_v63  ;;  %v574_v3 = vpop.f32.mrb[24].mxu0 }
 0x115   : > { %v575_v4 = vadd.f32 %v574_v3, %v1925_v42  ;;  %v576_v5 = vpop.f32.mrb[25].mxu0 }
 0x116   : > { %v577_v6 = vadd.f32 %v576_v5, %v1927_v43  ;;  %v578_v7 = vpop.f32.mrb[26].mxu0  ;;  %976 = vmatprep.mubr.bf16.mxu1 %v748_v2 }
 0x117   : > { %v579_v8 = vadd.f32 %v578_v7, %v1925_v42  ;;  %v580_v9 = vpop.f32.mrb[27].mxu0  ;;  %977 = vmatmul.mubr.bf16.gmra.mrb[36].mxu1 %v747_v1  ;;  %v697_v11 = vmax.f32 %v575_v4, 0.0 }
 0x118   : > { %v581_v10 = vadd.f32 %v580_v9, %v1927_v43  ;;  %v698_v13 = vmax.f32 %v577_v6, 0.0 }
 0x119   : > { %v699_v12 = vmax.f32 %v579_v8, 0.0 }
 0x11a   : > { %v700_v14 = vmax.f32 %v581_v10, 0.0 }
 0x11b   : > { %v749_v15 = vpack.c.bf16 %v699_v12, %v697_v11 }
 0x11c   : > { %v750_v16 = vpack.c.bf16 %v700_v14, %v698_v13  ;;  %v584_v17 = vpop.f32.mrb[28].mxu0 }
 0x11d   : > { %v585_v18 = vadd.f32 %v584_v17, %v1925_v42  ;;  %v586_v19 = vpop.f32.mrb[29].mxu0 }
 0x11e   : > { %v587_v20 = vadd.f32 %v586_v19, %v1927_v43  ;;  %v588_v21 = vpop.f32.mrb[30].mxu0  ;;  %984 = vmatprep.mubr.bf16.mxu1 %v750_v16 }
 0x11f   : > { %v589_v23 = vadd.f32 %v588_v21, %v1925_v42  ;;  %v590_v24 = vpop.f32.mrb[31].mxu0  ;;  %985 = vmatmul.mubr.bf16.gmra.mrb[40].mxu1 %v749_v15  ;;  %v701_v27 = vmax.f32 %v585_v18, 0.0 }
 0x120   : > { %v591_v26 = vadd.f32 %v590_v24, %v1927_v43  ;;  %v702_v30 = vmax.f32 %v587_v20, 0.0 }
 0x121   : > { %v703_v29 = vmax.f32 %v589_v23, 0.0 }
 0x122   : > { %v704_v32 = vmax.f32 %v591_v26, 0.0 }
 0x123   : > { %v751_v33 = vpack.c.bf16 %v703_v29, %v701_v27 }
 0x124   : > { %v752_v34 = vpack.c.bf16 %v704_v32, %v702_v30  ;;  %v594_v35 = vpop.f32.mrb[32].mxu0  ;;  %v1744_v30 = vld [vmem:[%s2161_s5 + $0x18] sm:$0xff]  }
 0x125   : > { %v595_v36 = vadd.f32 %v594_v35, %v1925_v42  ;;  %v596_v37 = vpop.f32.mrb[33].mxu0  ;;  %1648 = vmatprep.subr.bf16.mxu0 %v1744_v30 }
 0x126   : > { %v597_v38 = vadd.f32 %v596_v37, %v1927_v43  ;;  %v598_v39 = vpop.f32.mrb[34].mxu0  ;;  %992 = vmatprep.mubr.bf16.mxu1 %v752_v34  ;;  %1649 = vmatpush3.bf16.msra.mxu0 %v1744_v30 }
 0x127   : > { %v599_v40 = vadd.f32 %v598_v39, %v1925_v42  ;;  %v600_v41 = vpop.f32.mrb[35].mxu0  ;;  %993 = vmatmul.mubr.bf16.gmra.mrb[44].mxu1 %v751_v33  ;;  %v705_v45 = vmax.f32 %v595_v36, 0.0 }
 0x128   : > { %v601_v44 = vadd.f32 %v600_v41, %v1927_v43  ;;  %v706_v47 = vmax.f32 %v597_v38, 0.0  ;;  %v1747_v38 = vld [vmem:[%s2161_s5 + $0x30] sm:$0xff]  }
 0x129   : > { %v707_v46 = vmax.f32 %v599_v40, 0.0 }
 0x12a   : > { %v708_v48 = vmax.f32 %v601_v44, 0.0 }
 0x12b   : > { %v753_v49 = vpack.c.bf16 %v707_v46, %v705_v45 }
 0x12c   : > { %v754_v50 = vpack.c.bf16 %v708_v48, %v706_v47  ;;  %v604_v51 = vpop.f32.mrb[36].mxu0 }
 0x12d   : > { %v605_v52 = vadd.f32 %v604_v51, %v1925_v42  ;;  %v606_v53 = vpop.f32.mrb[37].mxu0 }
 0x12e   : > { %v607_v55 = vadd.f32 %v606_v53, %v1927_v43  ;;  %v608_v56 = vpop.f32.mrb[38].mxu0  ;;  %1000 = vmatprep.mubr.bf16.mxu1 %v754_v50 }
 0x12f   : > { %v609_v59 = vadd.f32 %v608_v56, %v1925_v42  ;;  %v610_v60 = vpop.f32.mrb[39].mxu0  ;;  %1001 = vmatmul.mubr.bf16.gmra.mrb[48].mxu1 %v753_v49  ;;  %v709_v63 = vmax.f32 %v605_v52, 0.0 }
 0x130   : > { %v611_v62 = vadd.f32 %v610_v60, %v1927_v43  ;;  %v710_v1 = vmax.f32 %v607_v55, 0.0 }
 0x131   : > { %v711_v0 = vmax.f32 %v609_v59, 0.0 }
 0x132   : > { %v712_v2 = vmax.f32 %v611_v62, 0.0 }
 0x133   : > { %v755_v3 = vpack.c.bf16 %v711_v0, %v709_v63 }
 0x134   : > { %v756_v4 = vpack.c.bf16 %v712_v2, %v710_v1  ;;  %v614_v5 = vpop.f32.mrb[40].mxu0 }
 0x135   : > { %v615_v6 = vadd.f32 %v614_v5, %v1925_v42  ;;  %v616_v7 = vpop.f32.mrb[41].mxu0 }
 0x136   : > { %v617_v8 = vadd.f32 %v616_v7, %v1927_v43  ;;  %v618_v9 = vpop.f32.mrb[42].mxu0  ;;  %1008 = vmatprep.mubr.bf16.mxu1 %v756_v4 }
 0x137   : > { %v619_v10 = vadd.f32 %v618_v9, %v1925_v42  ;;  %v620_v11 = vpop.f32.mrb[43].mxu0  ;;  %1009 = vmatmul.mubr.bf16.gmra.mrb[52].mxu1 %v755_v3  ;;  %v713_v13 = vmax.f32 %v615_v6, 0.0 }
 0x138   : > { %v621_v12 = vadd.f32 %v620_v11, %v1927_v43  ;;  %v714_v15 = vmax.f32 %v617_v8, 0.0 }
 0x139   : > { %v715_v14 = vmax.f32 %v619_v10, 0.0 }
 0x13a   : > { %v716_v16 = vmax.f32 %v621_v12, 0.0 }
 0x13b   : > { %v757_v17 = vpack.c.bf16 %v715_v14, %v713_v13 }
 0x13c   : > { %v758_v18 = vpack.c.bf16 %v716_v16, %v714_v15  ;;  %v624_v19 = vpop.f32.mrb[44].mxu0 }
 0x13d   : > { %v625_v20 = vadd.f32 %v624_v19, %v1925_v42  ;;  %v626_v21 = vpop.f32.mrb[45].mxu0 }
 0x13e   : > { %v627_v23 = vadd.f32 %v626_v21, %v1927_v43  ;;  %v628_v24 = vpop.f32.mrb[46].mxu0  ;;  %1016 = vmatprep.mubr.bf16.mxu1 %v758_v18 }
 0x13f   : > { %v629_v26 = vadd.f32 %v628_v24, %v1925_v42  ;;  %v630_v27 = vpop.f32.mrb[47].mxu0  ;;  %1017 = vmatmul.mubr.bf16.gmra.mrb[56].mxu1 %v757_v17  ;;  %v717_v32 = vmax.f32 %v625_v20, 0.0  ;;  %v1745_v42 = vld [vmem:[%s2161_s5 + $0x20] sm:$0xff]  }
 0x140   : > { %v631_v29 = vadd.f32 %v630_v27, %v1927_v43  ;;  %v718_v34 = vmax.f32 %v627_v23, 0.0  ;;  %1650 = vmatprep.subr.bf16.mxu0 %v1745_v42  ;;  %v1746_v43 = vld [vmem:[%s2161_s5 + $0x28] sm:$0xff]  }
 0x141   : > { %v719_v33 = vmax.f32 %v629_v26, 0.0  ;;  %1651 = vmatpush3.bf16.msra.mxu0 %v1745_v42 }
 0x142   : > { %v720_v35 = vmax.f32 %v631_v29, 0.0  ;;  %1652 = vmatprep.subr.bf16.mxu0 %v1746_v43 }
 0x143   : > { %v759_v36 = vpack.c.bf16 %v719_v33, %v717_v32 }
 0x144   : > { %v760_v37 = vpack.c.bf16 %v720_v35, %v718_v34 }
 0x145   : > { %1653 = vmatpush3.bf16.msra.mxu0 %v1746_v43 }
 0x146   : > { %1024 = vmatprep.mubr.bf16.mxu1 %v760_v37  ;;  %1654 = vmatprep.subr.bf16.mxu0 %v1747_v38 }
 0x147   : > { %1025 = vmatmul.mubr.bf16.gmra.mrb[60].mxu1 %v759_v36 }
 0x148   : > { %1032 = vmatprep.mubr.bf16.mxu1 %v1955_v31  ;;  %v1748_v31 = vld [vmem:[%s2161_s5 + $0x38] sm:$0xff]  }
 0x149   : > { %1655 = vmatpush3.bf16.msra.mxu0 %v1747_v38 }
 0x14a   : > { %1656 = vmatprep.subr.bf16.mxu0 %v1748_v31 }
 0x14d   : > { %1657 = vmatpush3.bf16.msra.mxu0 %v1748_v31 }
 0x14f   : > { %1033 = vmatmul.mubr.bf16.gmra.mrb[64].mxu1 %v1952_v28 }
 0x150   : > { %1040 = vmatprep.mubr.bf16.mxu1 %v1967_v61  ;;  %v2044_v61 = vld [vmem:[%s2160_s4] ss:$0 sm:$0xff] }
 0x157   : > { %1041 = vmatmul.mubr.bf16.gmra.mrb[68].mxu1 %v1964_v58 }
 0x158   : > { %1048 = vmatprep.mubr.bf16.mxu1 %v1979_v25 }
 0x15f   : > { %1049 = vmatmul.mubr.bf16.gmra.mrb[72].mxu1 %v1976_v22 }
 0x160   : > { %1056 = vmatprep.mubr.bf16.mxu1 %v1991_v57 }
 0x167   : > { %1057 = vmatmul.mubr.bf16.gmra.mrb[76].mxu1 %v1988_v54 }
 0x1c2   : > { %v1522_v28 = vpop.f32.mrb[16].mxu1 }
 0x1c3   : > { %v1523_v39 = vpop.f32.mrb[17].mxu1 }
 0x1c4   : > { %v1524_v40 = vadd.f32 %v1523_v39, %v1522_v28  ;;  %v1525_v41 = vpop.f32.mrb[18].mxu1 }
 0x1c5   : > { %v1526_v44 = vpop.f32.mrb[19].mxu1 }
 0x1c6   : > { %v939_v58 = vadd.f32 %v1524_v40, %v2044_v61  ;;  %v1527_v45 = vadd.f32 %v1526_v44, %v1525_v41 }
 0x1c8   : > { %v942_v25 = vadd.f32 %v1527_v45, %v2044_v61  ;;  %v1065_v22 = vmax.f32 %v939_v58, 0.0 }
 0x1ca   : > { %v1066_v46 = vmax.f32 %v942_v25, 0.0  ;;  %v1528_v57 = vpop.f32.mrb[20].mxu1 }
 0x1cb   : > { %v1529_v47 = vpop.f32.mrb[21].mxu1 }
 0x1cc   : > { %v1530_v54 = vadd.f32 %v1529_v47, %v1528_v57  ;;  %v1531_v48 = vpop.f32.mrb[22].mxu1  ;;  %v1097_v49 = vpack.c.bf16 %v1066_v46, %v1065_v22 }
 0x1cd   : > { %v1532_v50 = vpop.f32.mrb[23].mxu1 }
 0x1ce   : > { %v947_v51 = vadd.f32 %v1530_v54, %v2044_v61  ;;  %v1533_v52 = vadd.f32 %v1532_v50, %v1531_v48  ;;  %1658 = vmatprep.mubr.bf16.mxu0 %v1097_v49 }
 0x1d0   : > { %v950_v53 = vadd.f32 %v1533_v52, %v2044_v61  ;;  %v1067_v55 = vmax.f32 %v947_v51, 0.0 }
 0x1d2   : > { %v1068_v56 = vmax.f32 %v950_v53, 0.0  ;;  %v1534_v59 = vpop.f32.mrb[24].mxu1 }
 0x1d3   : > { %v1535_v60 = vpop.f32.mrb[25].mxu1 }
 0x1d4   : > { %v1098_v62 = vpack.c.bf16 %v1068_v56, %v1067_v55  ;;  %v1536_v63 = vadd.f32 %v1535_v60, %v1534_v59  ;;  %v1537_v0 = vpop.f32.mrb[26].mxu1 }
 0x1d5   : > { %v1538_v1 = vpop.f32.mrb[27].mxu1 }
 0x1d6   : > { %v955_v2 = vadd.f32 %v1536_v63, %v2044_v61  ;;  %v1539_v3 = vadd.f32 %v1538_v1, %v1537_v0  ;;  %1659 = vmatmul.mubr.bf16.vlgmr.msra.gmra.mrb[48].mxu0 %v1098_v62 }
 0x1d8   : > { %v958_v4 = vadd.f32 %v1539_v3, %v2044_v61  ;;  %v1069_v5 = vmax.f32 %v955_v2, 0.0 }
 0x1da   : > { %v1070_v6 = vmax.f32 %v958_v4, 0.0  ;;  %v1540_v7 = vpop.f32.mrb[28].mxu1 }
 0x1db   : > { %v1541_v8 = vpop.f32.mrb[29].mxu1 }
 0x1dc   : > { %v1542_v9 = vadd.f32 %v1541_v8, %v1540_v7  ;;  %v1543_v10 = vpop.f32.mrb[30].mxu1  ;;  %v1099_v11 = vpack.c.bf16 %v1070_v6, %v1069_v5 }
 0x1dd   : > { %v1544_v12 = vpop.f32.mrb[31].mxu1 }
 0x1de   : > { %v963_v13 = vadd.f32 %v1542_v9, %v2044_v61  ;;  %v1545_v14 = vadd.f32 %v1544_v12, %v1543_v10  ;;  %1662 = vmatprep.mubr.bf16.mxu0 %v1099_v11 }
 0x1e0   : > { %v966_v15 = vadd.f32 %v1545_v14, %v2044_v61  ;;  %v1071_v16 = vmax.f32 %v963_v13, 0.0 }
 0x1e2   : > { %v1072_v17 = vmax.f32 %v966_v15, 0.0  ;;  %v1546_v18 = vpop.f32.mrb[32].mxu1 }
 0x1e3   : > { %v1547_v19 = vpop.f32.mrb[33].mxu1 }
 0x1e4   : > { %v1548_v20 = vadd.f32 %v1547_v19, %v1546_v18  ;;  %v1549_v21 = vpop.f32.mrb[34].mxu1  ;;  %v1100_v23 = vpack.c.bf16 %v1072_v17, %v1071_v16 }
 0x1e5   : > { %v1550_v24 = vpop.f32.mrb[35].mxu1 }
 0x1e6   : > { %v971_v26 = vadd.f32 %v1548_v20, %v2044_v61  ;;  %v1551_v27 = vadd.f32 %v1550_v24, %v1549_v21  ;;  %1663 = vmatmul.mubr.bf16.gmra.mrb[52].mxu0 %v1100_v23 }
 0x1e8   : > { %v974_v29 = vadd.f32 %v1551_v27, %v2044_v61  ;;  %v1073_v30 = vmax.f32 %v971_v26, 0.0 }
 0x1ea   : > { %v1074_v32 = vmax.f32 %v974_v29, 0.0  ;;  %v1552_v33 = vpop.f32.mrb[36].mxu1 }
 0x1eb   : > { %v1553_v34 = vpop.f32.mrb[37].mxu1 }
 0x1ec   : > { %v1554_v35 = vadd.f32 %v1553_v34, %v1552_v33  ;;  %v1555_v36 = vpop.f32.mrb[38].mxu1  ;;  %v1101_v37 = vpack.c.bf16 %v1074_v32, %v1073_v30 }
 0x1ed   : > { %v1556_v42 = vpop.f32.mrb[39].mxu1 }
 0x1ee   : > { %v979_v43 = vadd.f32 %v1554_v35, %v2044_v61  ;;  %v1557_v38 = vadd.f32 %v1556_v42, %v1555_v36  ;;  %1666 = vmatprep.mubr.bf16.mxu0 %v1101_v37 }
 0x1f0   : > { %v982_v31 = vadd.f32 %v1557_v38, %v2044_v61  ;;  %v1075_v28 = vmax.f32 %v979_v43, 0.0 }
 0x1f2   : > { %v1076_v39 = vmax.f32 %v982_v31, 0.0  ;;  %v1558_v40 = vpop.f32.mrb[40].mxu1 }
 0x1f3   : > { %v1559_v41 = vpop.f32.mrb[41].mxu1 }
 0x1f4   : > { %v1560_v44 = vadd.f32 %v1559_v41, %v1558_v40  ;;  %v1561_v58 = vpop.f32.mrb[42].mxu1  ;;  %v1102_v45 = vpack.c.bf16 %v1076_v39, %v1075_v28 }
 0x1f5   : > { %v1562_v25 = vpop.f32.mrb[43].mxu1 }
 0x1f6   : > { %v987_v22 = vadd.f32 %v1560_v44, %v2044_v61  ;;  %v1563_v46 = vadd.f32 %v1562_v25, %v1561_v58  ;;  %1667 = vmatmul.mubr.bf16.gmra.mrb[56].mxu0 %v1102_v45 }
 0x1f8   : > { %v990_v57 = vadd.f32 %v1563_v46, %v2044_v61  ;;  %v1077_v47 = vmax.f32 %v987_v22, 0.0 }
 0x1fa   : > { %v1078_v54 = vmax.f32 %v990_v57, 0.0  ;;  %v1564_v48 = vpop.f32.mrb[44].mxu1 }
 0x1fb   : > { %v1565_v49 = vpop.f32.mrb[45].mxu1 }
 0x1fc   : > { %v1566_v50 = vadd.f32 %v1565_v49, %v1564_v48  ;;  %v1567_v51 = vpop.f32.mrb[46].mxu1  ;;  %v1103_v52 = vpack.c.bf16 %v1078_v54, %v1077_v47 }
 0x1fd   : > { %v1568_v53 = vpop.f32.mrb[47].mxu1 }
 0x1fe   : > { %v995_v55 = vadd.f32 %v1566_v50, %v2044_v61  ;;  %v1569_v56 = vadd.f32 %v1568_v53, %v1567_v51  ;;  %1670 = vmatprep.mubr.bf16.mxu0 %v1103_v52 }
 0x200   : > { %v998_v59 = vadd.f32 %v1569_v56, %v2044_v61  ;;  %v1079_v60 = vmax.f32 %v995_v55, 0.0 }
 0x202   : > { %v1080_v62 = vmax.f32 %v998_v59, 0.0  ;;  %v1570_v63 = vpop.f32.mrb[48].mxu1 }
 0x203   : > { %v1571_v0 = vpop.f32.mrb[49].mxu1 }
 0x204   : > { %v1572_v1 = vadd.f32 %v1571_v0, %v1570_v63  ;;  %v1573_v2 = vpop.f32.mrb[50].mxu1  ;;  %v1104_v3 = vpack.c.bf16 %v1080_v62, %v1079_v60 }
 0x205   : > { %v1574_v4 = vpop.f32.mrb[51].mxu1 }
 0x206   : > { %v1003_v5 = vadd.f32 %v1572_v1, %v2044_v61  ;;  %v1575_v6 = vadd.f32 %v1574_v4, %v1573_v2  ;;  %1671 = vmatmul.mubr.bf16.gmra.mrb[60].mxu0 %v1104_v3 }
 0x208   : > { %v1006_v7 = vadd.f32 %v1575_v6, %v2044_v61  ;;  %v1081_v8 = vmax.f32 %v1003_v5, 0.0 }
 0x20a   : > { %v1082_v9 = vmax.f32 %v1006_v7, 0.0  ;;  %v1576_v10 = vpop.f32.mrb[52].mxu1 }
 0x20b   : > { %v1577_v11 = vpop.f32.mrb[53].mxu1 }
 0x20c   : > { %v1578_v12 = vadd.f32 %v1577_v11, %v1576_v10  ;;  %v1579_v13 = vpop.f32.mrb[54].mxu1  ;;  %v1105_v14 = vpack.c.bf16 %v1082_v9, %v1081_v8 }
 0x20d   : > { %v1580_v15 = vpop.f32.mrb[55].mxu1 }
 0x20e   : > { %v1011_v16 = vadd.f32 %v1578_v12, %v2044_v61  ;;  %v1581_v17 = vadd.f32 %v1580_v15, %v1579_v13  ;;  %1674 = vmatprep.mubr.bf16.mxu0 %v1105_v14 }
 0x210   : > { %v1014_v18 = vadd.f32 %v1581_v17, %v2044_v61  ;;  %v1083_v19 = vmax.f32 %v1011_v16, 0.0 }
 0x212   : > { %v1084_v20 = vmax.f32 %v1014_v18, 0.0  ;;  %v1582_v21 = vpop.f32.mrb[56].mxu1 }
 0x213   : > { %v1583_v23 = vpop.f32.mrb[57].mxu1 }
 0x214   : > { %v1584_v24 = vadd.f32 %v1583_v23, %v1582_v21  ;;  %v1585_v26 = vpop.f32.mrb[58].mxu1  ;;  %v1106_v27 = vpack.c.bf16 %v1084_v20, %v1083_v19 }
 0x215   : > { %v1586_v29 = vpop.f32.mrb[59].mxu1 }
 0x216   : > { %v1019_v30 = vadd.f32 %v1584_v24, %v2044_v61  ;;  %v1587_v32 = vadd.f32 %v1586_v29, %v1585_v26  ;;  %1675 = vmatmul.mubr.bf16.gmra.mrb[64].mxu0 %v1106_v27  ;;  %v2082_v27 = vld [vmem:[%s2162_s6] ss:$0 sm:$0xff] }
 0x218   : > { %v1022_v33 = vadd.f32 %v1587_v32, %v2044_v61  ;;  %v1085_v34 = vmax.f32 %v1019_v30, 0.0 }
 0x21a   : > { %v1086_v35 = vmax.f32 %v1022_v33, 0.0  ;;  %v1588_v36 = vpop.f32.mrb[60].mxu1 }
 0x21b   : > { %v1589_v37 = vpop.f32.mrb[61].mxu1 }
 0x21c   : > { %v1590_v42 = vadd.f32 %v1589_v37, %v1588_v36  ;;  %v1591_v43 = vpop.f32.mrb[62].mxu1  ;;  %v1107_v38 = vpack.c.bf16 %v1086_v35, %v1085_v34 }
 0x21d   : > { %v1592_v31 = vpop.f32.mrb[63].mxu1 }
 0x21e   : > { %v1027_v28 = vadd.f32 %v1590_v42, %v2044_v61  ;;  %v1593_v39 = vadd.f32 %v1592_v31, %v1591_v43  ;;  %1678 = vmatprep.mubr.bf16.mxu0 %v1107_v38 }
 0x220   : > { %v1030_v40 = vadd.f32 %v1593_v39, %v2044_v61  ;;  %v1087_v41 = vmax.f32 %v1027_v28, 0.0 }
 0x222   : > { %v1088_v44 = vmax.f32 %v1030_v40, 0.0  ;;  %v1594_v58 = vpop.f32.mrb[64].mxu1 }
 0x223   : > { %v1595_v45 = vpop.f32.mrb[65].mxu1 }
 0x224   : > { %v1596_v25 = vadd.f32 %v1595_v45, %v1594_v58  ;;  %v1597_v22 = vpop.f32.mrb[66].mxu1  ;;  %v1108_v46 = vpack.c.bf16 %v1088_v44, %v1087_v41 }
 0x225   : > { %v1598_v57 = vpop.f32.mrb[67].mxu1 }
 0x226   : > { %v1035_v47 = vadd.f32 %v1596_v25, %v2044_v61  ;;  %v1599_v54 = vadd.f32 %v1598_v57, %v1597_v22  ;;  %1679 = vmatmul.mubr.bf16.gmra.mrb[68].mxu0 %v1108_v46 }
 0x228   : > { %v1038_v48 = vadd.f32 %v1599_v54, %v2044_v61  ;;  %v1089_v49 = vmax.f32 %v1035_v47, 0.0 }
 0x22a   : > { %v1090_v50 = vmax.f32 %v1038_v48, 0.0  ;;  %v1600_v51 = vpop.f32.mrb[68].mxu1 }
 0x22b   : > { %v1601_v52 = vpop.f32.mrb[69].mxu1 }
 0x22c   : > { %v1602_v53 = vadd.f32 %v1601_v52, %v1600_v51  ;;  %v1603_v55 = vpop.f32.mrb[70].mxu1  ;;  %v1109_v56 = vpack.c.bf16 %v1090_v50, %v1089_v49 }
 0x22d   : > { %v1604_v59 = vpop.f32.mrb[71].mxu1 }
 0x22e   : > { %v1043_v60 = vadd.f32 %v1602_v53, %v2044_v61  ;;  %v1605_v62 = vadd.f32 %v1604_v59, %v1603_v55  ;;  %1682 = vmatprep.mubr.bf16.mxu0 %v1109_v56 }
 0x230   : > { %v1046_v63 = vadd.f32 %v1605_v62, %v2044_v61  ;;  %v1091_v0 = vmax.f32 %v1043_v60, 0.0 }
 0x232   : > { %v1092_v1 = vmax.f32 %v1046_v63, 0.0  ;;  %v1606_v2 = vpop.f32.mrb[72].mxu1 }
 0x233   : > { %v1607_v3 = vpop.f32.mrb[73].mxu1 }
 0x234   : > { %v1608_v4 = vadd.f32 %v1607_v3, %v1606_v2  ;;  %v1609_v5 = vpop.f32.mrb[74].mxu1  ;;  %v1110_v6 = vpack.c.bf16 %v1092_v1, %v1091_v0 }
 0x235   : > { %v1610_v7 = vpop.f32.mrb[75].mxu1 }
 0x236   : > { %v1051_v8 = vadd.f32 %v1608_v4, %v2044_v61  ;;  %v1611_v9 = vadd.f32 %v1610_v7, %v1609_v5  ;;  %1683 = vmatmul.mubr.bf16.gmra.mrb[72].mxu0 %v1110_v6 }
 0x238   : > { %v1054_v10 = vadd.f32 %v1611_v9, %v2044_v61  ;;  %v1093_v11 = vmax.f32 %v1051_v8, 0.0 }
 0x23a   : > { %v1094_v12 = vmax.f32 %v1054_v10, 0.0  ;;  %v1612_v13 = vpop.f32.mrb[76].mxu1 }
 0x23b   : > { %v1613_v14 = vpop.f32.mrb[77].mxu1 }
 0x23c   : > { %v1614_v15 = vadd.f32 %v1613_v14, %v1612_v13  ;;  %v1615_v16 = vpop.f32.mrb[78].mxu1  ;;  %v1111_v17 = vpack.c.bf16 %v1094_v12, %v1093_v11 }
 0x23d   : > { %v1616_v18 = vpop.f32.mrb[79].mxu1 }
 0x23e   : > { %v1059_v19 = vadd.f32 %v1614_v15, %v2044_v61  ;;  %v1617_v20 = vadd.f32 %v1616_v18, %v1615_v16  ;;  %1686 = vmatprep.mubr.bf16.mxu0 %v1111_v17 }
 0x240   : > { %v1062_v21 = vadd.f32 %v1617_v20, %v2044_v61  ;;  %v1095_v23 = vmax.f32 %v1059_v19, 0.0 }
 0x242   : > { %v1096_v24 = vmax.f32 %v1062_v21, 0.0 }
 0x244   : > { %v1112_v26 = vpack.c.bf16 %v1096_v24, %v1095_v23 }
 0x246   : > { %1687 = vmatmul.mubr.bf16.gmra.mrb[76].mxu0 %v1112_v26 }
 0x2a9   : > { %v1660_v61 = vpop.f32.mrb[48].mxu0 }
 0x2aa   : > { %v1227_v29 = vadd.f32 %v1660_v61, %v2082_v27  ;;  %v1218_v30 = vpop.f32.mrb[49].mxu0 }
 0x2ab   : > { %v1219_v32 = vadd.f32 %v2082_v27, %v1218_v30  ;;  %v1661_v33 = vpop.f32.mrb[50].mxu0 }
 0x2ac   : > { %1347 = vst [vmem:[%s2087_s10 + $0x10] sm:$0xff] %v1227_v29  ;;  %v1230_v34 = vadd.f32 %v1661_v33, %v2082_v27  ;;  %v1221_v35 = vpop.f32.mrb[51].mxu0 }
 0x2ad   : > { %1345 = vst [vmem:[%s2087_s10] sm:$0xff] %v1219_v32  ;;  %v1222_v36 = vadd.f32 %v2082_v27, %v1221_v35 }
 0x2ae   : > { %1348 = vst [vmem:[%s2087_s10 + $0x18] sm:$0xff] %v1230_v34 }
 0x2af   : > { %1346 = vst [vmem:[%s2087_s10 + $0x8] sm:$0xff] %v1222_v36 }
 0x2b9   : > { %v1664_v37 = vpop.f32.mrb[52].mxu0 }
 0x2ba   : > { %v1243_v42 = vadd.f32 %v1664_v37, %v2082_v27  ;;  %v1234_v43 = vpop.f32.mrb[53].mxu0 }
 0x2bb   : > { %v1235_v38 = vadd.f32 %v2082_v27, %v1234_v43  ;;  %v1665_v31 = vpop.f32.mrb[54].mxu0 }
 0x2bc   : > { %1351 = vst [vmem:[%s2087_s10 + $0x30] sm:$0xff] %v1243_v42  ;;  %v1246_v28 = vadd.f32 %v1665_v31, %v2082_v27  ;;  %v1237_v39 = vpop.f32.mrb[55].mxu0 }
 0x2bd   : > { %1349 = vst [vmem:[%s2087_s10 + $0x20] sm:$0xff] %v1235_v38  ;;  %v1238_v40 = vadd.f32 %v2082_v27, %v1237_v39 }
 0x2be   : > { %1352 = vst [vmem:[%s2087_s10 + $0x38] sm:$0xff] %v1246_v28 }
 0x2bf   : > { %1350 = vst [vmem:[%s2087_s10 + $0x28] sm:$0xff] %v1238_v40 }
 0x2c9   : > { %v1668_v41 = vpop.f32.mrb[56].mxu0 }
 0x2ca   : > { %v1259_v44 = vadd.f32 %v1668_v41, %v2082_v27  ;;  %v1250_v58 = vpop.f32.mrb[57].mxu0 }
 0x2cb   : > { %v1251_v45 = vadd.f32 %v2082_v27, %v1250_v58  ;;  %v1669_v25 = vpop.f32.mrb[58].mxu0 }
 0x2cc   : > { %1355 = vst [vmem:[%s2087_s10 + $0x50] sm:$0xff] %v1259_v44  ;;  %v1262_v22 = vadd.f32 %v1669_v25, %v2082_v27  ;;  %v1253_v46 = vpop.f32.mrb[59].mxu0 }
 0x2cd   : > { %1353 = vst [vmem:[%s2087_s10 + $0x40] sm:$0xff] %v1251_v45  ;;  %v1254_v57 = vadd.f32 %v2082_v27, %v1253_v46 }
 0x2ce   : > { %1356 = vst [vmem:[%s2087_s10 + $0x58] sm:$0xff] %v1262_v22 }
 0x2cf   : > { %1354 = vst [vmem:[%s2087_s10 + $0x48] sm:$0xff] %v1254_v57 }
 0x2d9   : > { %v1672_v47 = vpop.f32.mrb[60].mxu0 }
 0x2da   : > { %v1275_v54 = vadd.f32 %v1672_v47, %v2082_v27  ;;  %v1266_v48 = vpop.f32.mrb[61].mxu0 }
 0x2db   : > { %v1267_v49 = vadd.f32 %v2082_v27, %v1266_v48  ;;  %v1673_v50 = vpop.f32.mrb[62].mxu0 }
 0x2dc   : > { %1359 = vst [vmem:[%s2087_s10 + $0x70] sm:$0xff] %v1275_v54  ;;  %v1278_v51 = vadd.f32 %v1673_v50, %v2082_v27  ;;  %v1269_v52 = vpop.f32.mrb[63].mxu0 }
 0x2dd   : > { %1357 = vst [vmem:[%s2087_s10 + $0x60] sm:$0xff] %v1267_v49  ;;  %v1270_v53 = vadd.f32 %v2082_v27, %v1269_v52 }
 0x2de   : > { %1360 = vst [vmem:[%s2087_s10 + $0x78] sm:$0xff] %v1278_v51 }
 0x2df   : > { %1358 = vst [vmem:[%s2087_s10 + $0x68] sm:$0xff] %v1270_v53 }
 0x2e9   : > { %v1676_v55 = vpop.f32.mrb[64].mxu0 }
 0x2ea   : > { %v1291_v56 = vadd.f32 %v1676_v55, %v2082_v27  ;;  %v1282_v59 = vpop.f32.mrb[65].mxu0 }
 0x2eb   : > { %v1283_v60 = vadd.f32 %v2082_v27, %v1282_v59  ;;  %v1677_v62 = vpop.f32.mrb[66].mxu0 }
 0x2ec   : > { %1363 = vst [vmem:[%s2087_s10 + $0x90] sm:$0xff] %v1291_v56  ;;  %v1294_v63 = vadd.f32 %v1677_v62, %v2082_v27  ;;  %v1285_v0 = vpop.f32.mrb[67].mxu0 }
 0x2ed   : > { %1361 = vst [vmem:[%s2087_s10 + $0x80] sm:$0xff] %v1283_v60  ;;  %v1286_v1 = vadd.f32 %v2082_v27, %v1285_v0 }
 0x2ee   : > { %1364 = vst [vmem:[%s2087_s10 + $0x98] sm:$0xff] %v1294_v63 }
 0x2ef   : > { %1362 = vst [vmem:[%s2087_s10 + $0x88] sm:$0xff] %v1286_v1 }
 0x2f9   : > { %v1680_v2 = vpop.f32.mrb[68].mxu0 }
 0x2fa   : > { %v1307_v3 = vadd.f32 %v1680_v2, %v2082_v27  ;;  %v1298_v4 = vpop.f32.mrb[69].mxu0 }
 0x2fb   : > { %v1299_v5 = vadd.f32 %v2082_v27, %v1298_v4  ;;  %v1681_v6 = vpop.f32.mrb[70].mxu0 }
 0x2fc   : > { %1367 = vst [vmem:[%s2087_s10 + $0xb0] sm:$0xff] %v1307_v3  ;;  %v1310_v7 = vadd.f32 %v1681_v6, %v2082_v27  ;;  %v1301_v8 = vpop.f32.mrb[71].mxu0 }
 0x2fd   : > { %1365 = vst [vmem:[%s2087_s10 + $0xa0] sm:$0xff] %v1299_v5  ;;  %v1302_v9 = vadd.f32 %v2082_v27, %v1301_v8 }
 0x2fe   : > { %1368 = vst [vmem:[%s2087_s10 + $0xb8] sm:$0xff] %v1310_v7 }
 0x2ff   : > { %1366 = vst [vmem:[%s2087_s10 + $0xa8] sm:$0xff] %v1302_v9 }
 0x309   : > { %v1684_v10 = vpop.f32.mrb[72].mxu0 }
 0x30a   : > { %v1323_v11 = vadd.f32 %v1684_v10, %v2082_v27  ;;  %v1314_v12 = vpop.f32.mrb[73].mxu0 }
 0x30b   : > { %v1315_v13 = vadd.f32 %v2082_v27, %v1314_v12  ;;  %v1685_v14 = vpop.f32.mrb[74].mxu0 }
 0x30c   : > { %1371 = vst [vmem:[%s2087_s10 + $0xd0] sm:$0xff] %v1323_v11  ;;  %v1326_v15 = vadd.f32 %v1685_v14, %v2082_v27  ;;  %v1317_v16 = vpop.f32.mrb[75].mxu0 }
 0x30d   : > { %1369 = vst [vmem:[%s2087_s10 + $0xc0] sm:$0xff] %v1315_v13  ;;  %v1318_v17 = vadd.f32 %v2082_v27, %v1317_v16 }
 0x30e   : > { %1372 = vst [vmem:[%s2087_s10 + $0xd8] sm:$0xff] %v1326_v15 }
 0x30f   : > { %1370 = vst [vmem:[%s2087_s10 + $0xc8] sm:$0xff] %v1318_v17 }
 0x319   : > { %v1688_v18 = vpop.f32.mrb[76].mxu0 }
 0x31a   : > { %v1339_v19 = vadd.f32 %v1688_v18, %v2082_v27  ;;  %v1330_v20 = vpop.f32.mrb[77].mxu0 }
 0x31b   : > { %v1331_v21 = vadd.f32 %v2082_v27, %v1330_v20  ;;  %v1689_v23 = vpop.f32.mrb[78].mxu0 }
 0x31c   : > { %1375 = vst [vmem:[%s2087_s10 + $0xf0] sm:$0xff] %v1339_v19  ;;  %v1342_v24 = vadd.f32 %v1689_v23, %v2082_v27  ;;  %v1333_v26 = vpop.f32.mrb[79].mxu0 }
 0x31d   : > { %1373 = vst [vmem:[%s2087_s10 + $0xe0] sm:$0xff] %v1331_v21  ;;  %v1334_v61 = vadd.f32 %v2082_v27, %v1333_v26 }
 0x31e   : > { %1376 = vst [vmem:[%s2087_s10 + $0xf8] sm:$0xff] %v1342_v24 }
 0x31f   : > { %1374 = vst [vmem:[%s2087_s10 + $0xe8] sm:$0xff] %v1334_v61 }
 0x320 PF: > { %s17_s24 = sadd.s32 1, %s1755_s24  }
 0x321   : > { %p14_p4 = scmp.ge.s32.totalorder %s17_s24, 4  }
 0x323   :  { %16 = sbr.rel (!%p14_p4) target bundleno = 1 (0x1), region = 78 }

</bundles_post_ra>
